<compile_context>
chip_gen: v7x
topology: tpu7x:2x2x1
jax: 0.10.0
libtpu: 0.0.40
codegen_flags: <defaults>
</compile_context>

<pallas_src>
import jax
import jax.numpy as jnp
from jax.experimental import pallas as pl
from jax.experimental.pallas import tpu as pltpu


def _normalize_kernel(stats_ref, x_ref, o_ref):
    """Streaming pass: out = x * (1/std) + (-mean/std). Stats are two scalars in SMEM."""
    shift = stats_ref[0, 0]
    scale = stats_ref[0, 1]
    # Single fused multiply-add per element keeps the VPU far under the store/DMA bound.
    o_ref[...] = (x_ref[...] * scale + shift).astype(o_ref.dtype)


_MAX_LANES = 4096  # any multiple of 128 gives unmasked vst; cap keeps single rows modest.


def _vmem_plan():
    """(vmem_limit_bytes, target_tile_bytes) sized from physical VMEM with headroom.

    v5e/v6e: 128 MiB physical -> 64 MiB limit, 8 MiB tiles.
    v7x:      64 MiB per TC   -> 32 MiB limit, 4 MiB tiles.
    Fallback (query unavailable): the conservative v7x plan — safe everywhere.
    """
    try:
        cap = pltpu.get_tpu_info().vmem_capacity_bytes
    except Exception:
        cap = 64 * 1024 * 1024
    vmem_limit = min(cap // 2, 64 * 1024 * 1024)
    # Live footprint = (1 input + 1 output) x double-buffered = 4 tiles -> half the limit.
    target_tile = vmem_limit // 8
    return vmem_limit, target_tile


def _plan_layout(total_elems: int, itemsize: int, target_tile_bytes: int):
    """Largest 128-multiple divisor of `total_elems` as lanes (zero-copy reshape) + row tile."""
    lanes = 0
    for cand in range(_MAX_LANES, 127, -128):
        if total_elems % cand == 0:
            lanes = cand
            break
    if lanes == 0:
        return None  # ragged element count: caller falls back to a minimally padded layout
    rows = total_elems // lanes
    tile_rows = max(8, target_tile_bytes // (lanes * itemsize))
    if tile_rows >= rows:
        tile_rows = rows                 # block == full extent along rows: allowed
    else:
        tile_rows -= tile_rows % 8       # sublane-aligned (8) tile
    return lanes, rows, tile_rows


def _run_normalize(x2d, stats, rows, lanes, tile_rows, vmem_limit):
    total = rows * lanes
    cost = pl.CostEstimate(
        flops=2 * total,
        transcendentals=0,
        bytes_accessed=2 * total * x2d.dtype.itemsize + stats.size * 4,
    )
    return pl.pallas_call(
        _normalize_kernel,
        out_shape=jax.ShapeDtypeStruct((rows, lanes), x2d.dtype),
        grid=(pl.cdiv(rows, tile_rows),),    # partial last block handled by Pallas masking
        in_specs=[
            pl.BlockSpec(memory_space=pltpu.MemorySpace.SMEM),    # [shift, scale] scalars
            pl.BlockSpec((tile_rows, lanes), lambda i: (i, 0)),   # vector row-tile
        ],
        out_specs=pl.BlockSpec((tile_rows, lanes), lambda i: (i, 0)),
        compiler_params=pltpu.CompilerParams(
            # TODO(synk): on v7x, pltpu.CORE_PARALLEL (or an explicit core_map split) is needed
            # to truly shard this axis across the 2 TensorCores; "parallel" kept for portability.
            dimension_semantics=("parallel",),
            vmem_limit_bytes=vmem_limit,
        ),
        cost_estimate=cost,
    )(stats, x2d)


def conditional_layer_norm(vector, style_embedding, weight, bias):
    """
    Args:
        vector:          [B, C, N]
        style_embedding: [B, style_dim, 1]
        weight:          [vector_dim, style_dim]   (PyTorch nn.Linear layout)
        bias:            [vector_dim]
    Returns:
        [B, C, N], same dtype as `vector`.
    """
    B, C, N = vector.shape

    # --- Stats: Linear + global mean / unbiased std (microscopic; fused by XLA, off hot path). ---
    feats = (style_embedding[..., 0].astype(jnp.float32)
             @ weight.T.astype(jnp.float32) + bias.astype(jnp.float32))   # [B, vector_dim]
    n = feats.size
    mean = jnp.sum(feats) / n
    centered = feats - mean
    # torch.Tensor.std() is the unbiased estimator (divide by N-1). Faithful to PyTorch:
    # no epsilon, and n == 1 divides by zero exactly as torch does.
    var = jnp.sum(centered * centered) / (n - 1)
    inv_std = jax.lax.rsqrt(var)
    shift = -mean * inv_std                      # out = x*inv_std + shift == (x - mean)/std
    stats = jnp.stack([shift, inv_std]).reshape(1, 2).astype(jnp.float32)

    # --- Normalize: lane-dense, tiled, double-buffered streaming FMA. ---
    total = B * C * N
    vmem_limit, target_tile = _vmem_plan()
    plan = _plan_layout(total, vector.dtype.itemsize, target_tile)

    if plan is not None:
        lanes, rows, tile_rows = plan
        x2d = vector.reshape(rows, lanes)        # zero-copy: same contiguous row-major buffer
        out2d = _run_normalize(x2d, stats, rows, lanes, tile_rows, vmem_limit)
        return out2d.reshape(B, C, N)

    # Ragged fallback (element count not a multiple of 128): pad to one extra 128-lane row.
    # TODO(synk): a tiny tail kernel would avoid this pad/slice copy for the rare ragged case.
    lanes = 128
    rows = pl.cdiv(total, lanes)
    flat = jnp.pad(vector.reshape(-1), (0, rows * lanes - total))
    tile_rows = max(8, target_tile // (lanes * vector.dtype.itemsize))
    if tile_rows >= rows:
        tile_rows = rows
    else:
        tile_rows -= tile_rows % 8
    out2d = _run_normalize(flat.reshape(rows, lanes), stats, rows, lanes, tile_rows, vmem_limit)
    return out2d.reshape(-1)[:total].reshape(B, C, N)


def _reference(vector, style_embedding, weight, bias):
    feats = style_embedding[..., 0] @ weight.T + bias          # [B, vector_dim]
    mean = jnp.mean(feats)
    std = jnp.sqrt(jnp.sum((feats - mean) ** 2) / (feats.size - 1))
    return (vector - mean) / std


if __name__ == "__main__":
    # Shapes implied by the module: vector [B, C, N], style_embedding [B, style_dim, 1].
    B, C, N = 2, 4, 16
    style_dim, vector_dim = 8, C

    key = jax.random.PRNGKey(0)
    k_vec, k_style, k_w, k_b = jax.random.split(key, 4)

    vector = jax.random.normal(k_vec, (B, C, N), dtype=jnp.float32)
    style_embedding = jax.random.normal(k_style, (B, style_dim, 1), dtype=jnp.float32)

    # PyTorch nn.Linear default init: U(-1/sqrt(in_features), 1/sqrt(in_features))
    bound = 1.0 / (style_dim ** 0.5)
    weight = jax.random.uniform(k_w, (vector_dim, style_dim),
                                minval=-bound, maxval=bound, dtype=jnp.float32)
    bias = jax.random.uniform(k_b, (vector_dim,),
                              minval=-bound, maxval=bound, dtype=jnp.float32)

    out = conditional_layer_norm(vector, style_embedding, weight, bias)
    out = jax.block_until_ready(out)

    ref = _reference(vector, style_embedding, weight, bias)
    assert out.shape == (B, C, N)
    assert jnp.allclose(out, ref, atol=1e-5, rtol=1e-5), "mismatch vs JAX reference"

    print("KERNEL_OK")
</pallas_src>

<mosaic_0001>
module attributes {stable_mosaic.version = 11 : i64} {
  func.func @_normalize_kernel(%arg0: i32, %arg1: memref<1x2xf32, #tpu.memory_space<smem>>, %arg2: memref<1x128xf32, #tpu.memory_space<vmem>>, %arg3: memref<1x128xf32, #tpu.memory_space<vmem>>) attributes {dimension_semantics = [#tpu.dimension_semantics<parallel>], iteration_bounds = array<i64: 1>, scalar_prefetch = 0 : i64, scratch_operands = 0 : i64, tpu.core_type = #tpu.core_type<tc>, window_params = [{transform_indices = @transform_0, window_bounds = array<i64: 1, 2>}, {transform_indices = @transform_1, window_bounds = array<i64: 1, 128>}, {transform_indices = @transform_2, window_bounds = array<i64: 1, 128>}]} {
    %c0 = arith.constant 0 : index
    %c0_0 = arith.constant 0 : index
    %0 = memref.load %arg1[%c0, %c0_0] : memref<1x2xf32, #tpu.memory_space<smem>>
    %c0_1 = arith.constant 0 : index
    %c1 = arith.constant 1 : index
    %1 = memref.load %arg1[%c0_1, %c1] : memref<1x2xf32, #tpu.memory_space<smem>>
    %c0_2 = arith.constant 0 : index
    %c0_3 = arith.constant 0 : index
    %2 = vector.load %arg2[%c0_2, %c0_3] : memref<1x128xf32, #tpu.memory_space<vmem>>, vector<1x128xf32>
    %3 = vector.broadcast %1 : f32 to vector<1x128xf32>
    %4 = arith.mulf %2, %3 : vector<1x128xf32>
    %5 = vector.broadcast %0 : f32 to vector<1x128xf32>
    %6 = arith.addf %4, %5 : vector<1x128xf32>
    %c0_4 = arith.constant 0 : index
    %c0_5 = arith.constant 0 : index
    %7 = vector.load %arg3[%c0_4, %c0_5] : memref<1x128xf32, #tpu.memory_space<vmem>>, vector<1x128xf32>
    tpu.vector_store %arg3[%c0_4, %c0_5], %6 {strides = array<i32>} : memref<1x128xf32, #tpu.memory_space<vmem>>, vector<1x128xf32>,
    return
  }
  func.func @transform_0(%arg0: i32) -> (i32, i32) {
    %c0_i32 = arith.constant 0 : i32
    %c0_i32_0 = arith.constant 0 : i32
    %c0_i32_1 = arith.constant 0 : i32
    return %c0_i32, %c0_i32_0 : i32, i32
  }
  func.func @transform_1(%arg0: i32) -> (i32, i32) {
    %c0_i32 = arith.constant 0 : i32
    %c0_i32_0 = arith.constant 0 : i32
    return %arg0, %c0_i32 : i32, i32
  }
  func.func @transform_2(%arg0: i32) -> (i32, i32) {
    %c0_i32 = arith.constant 0 : i32
    %c0_i32_0 = arith.constant 0 : i32
    return %arg0, %c0_i32 : i32, i32
  }
}

</mosaic_0001>

<bundles_post_ra>
// kernel: tpu_custom_call.1
= control target key start
LH: loop header
LB: loop body
LE: loop exit
PB: predicated region body
PF: predicated region fallthrough
CT: control target
= control target key end

     0   :  { %7 = vsyncpa [#allocation4], 0  ;;  %s129_s0 = inlined_call_operand.hbm [shape: f32[1,2], index: 0, kind: input, shape index: {}]   ;;  %s130_s1 = inlined_call_operand.vmem [shape: f32[1,128], index: 1, kind: input, shape index: {}]   ;;  %s131_s2 = inlined_call_operand.hbm [shape: f32[1,128], index: 2, kind: output, shape index: {}]  }
   0x1   :  { %8 = vsyncpa [#allocation3], 0  ;;  %s49_s11 = scalar_lea.hbm %s129_s0, 16 }
   0x2   :  { %p50_p0 = scmp.ne.s32.totalorder %s129_s0, %s49_s11  ;;  %p53_p1 = scmp.lt.u32.totalorder %s49_s11, %s129_s0 }
   0x4   :  { %p55_p2 = pnand %p53_p1, %p50_p0 }
   0x6   :  { %58 = shalt.err (!%p55_p2)
}
   0x7   :  { %s85_s16 = smov [#allocation2]  }
   0x8   :  { %16 = dma.hbm_to_smem %s129_s0, 16, %s85_s16, [#allocation4]  }
   0x9   :  { %81 = dma.done.wait [#allocation4], 16  }
   0xa   :  { %82 = vsyncadd [#allocation4], 4294967280 }
   0xb   :  { %22 = sfence }
   0xc   :  { %s23_s19 = sld [smem:[#allocation2]]  ;;  %s46_s20 = sld [smem:[#allocation2 + $0x1]]  ;;  %v25_v0 = vld [vmem:[%s130_s1] sm:$0x1] }
   0xd   :  { %s86_s23 = smov [#allocation5]  }
   0xe   :  { %s37_s24 = sshll.u32 %s86_s23, 4  ;;  %s38_s24 = int_to_ptr.vmem [resolvable:$true] %s37_s24 }
   0xf   :  { %s59_s25 = scalar_lea.vmem %s38_s24, 16  ;;  %s63_s0 = scalar_lea.vmem %s38_s24, 32 }
  0x10   :  { %p60_p3 = scmp.ne.s32.totalorder %s38_s24, %s59_s25  ;;  %p64_p4 = scmp.lt.s32.totalorder %s38_s24, %s38_s24 }
  0x11   :  { %p65_p5 = scmp.lt.s32.totalorder %s63_s0, %s59_s25 }
  0x12   :  { %v26_v1 = vstv %s46_s20  ;;  %v28_v2 = vstv %s23_s19 }
  0x13   :  { %v27_v3 = vmul.f32 %v26_v1, %v25_v0  ;;  %p66_p6 = por %p65_p5, %p64_p4 }
  0x15   :  { %v29_v4 = vadd.f32 %v28_v2, %v27_v3  ;;  %p67_p7 = pnand %p66_p6, %p60_p3 }
  0x17   :  { %30 = vst [vmem:[#allocation5] sm:$0x1] %v29_v4 }
  0x18   :  { %70 = shalt.err (!%p67_p7)
}
  0x19   :  { %s71_s1 = scalar_lea.hbm %s131_s2, 16 }
  0x1a   :  { %p72_p8 = scmp.ne.s32.totalorder %s131_s2, %s71_s1  ;;  %p75_p9 = scmp.lt.u32.totalorder %s71_s1, %s131_s2 }
  0x1c   :  { %p77_p10 = pnand %p75_p9, %p72_p8 }
  0x1e   :  { %80 = shalt.err (!%p77_p10)
}
  0x1f   :  { %40 = dma.vmem_to_hbm [thread:$0]  %s38_s24, 16, %s131_s2, [#allocation3]  }
  0x20   :  { %83 = dma.done.wait [#allocation3], 16  }
  0x21   :  { %84 = vsyncadd [#allocation3], 4294967280 }
  0x22   :  { %44 = vsyncpa [#allocation3], 1 }
  0x23   :  { %45 = vsyncpa [#allocation4], 1 }

</bundles_post_ra>
